<compile_context>
chip_gen: v7x
topology: tpu7x:2x2x1
jax: 0.10.0
libtpu: 0.0.40
codegen_flags: <defaults>
</compile_context>

<pallas_src>
import jax
import jax.numpy as jnp
import numpy as np
from jax.experimental import pallas as pl
from jax.experimental.pallas import tpu as pltpu


def _sparse_transition_kernel(x_ref, s_ref, b_ref, w_ref, p_ref, o_ref):
    """Fused BN(inference) + ReLU + (select/mask folded) 1x1 conv + 2x2 avg-pool.

    x_ref: (C, H*W)        one batch element, channels on sublanes, pixels on lanes
    s_ref: (C, 1)          folded BN scale  = gamma / sqrt(var + eps)
    b_ref: (C, 1)          folded BN bias   = beta - mean * scale
    w_ref: (P, C)          1x1 conv weight, expanded to all C channels with
                           alpha folded in and zeros on non-selected channels
    p_ref: (H*W, Ho*Wo)    static 2x2 average-pooling matrix (entries 0 / 0.25)
    o_ref: (P, Ho*Wo)      pooled conv output (NCHW layout, flattened spatial)
    """
    # BatchNorm (inference) + ReLU on the full channel set (lane-dense, 256 wide).
    act = jnp.maximum(x_ref[...] * s_ref[...] + b_ref[...], 0.0)        # (C, HW)

    # 1x1 conv as one MXU matmul (selection + alpha already folded into w_ref).
    conv = jnp.dot(w_ref[...], act, preferred_element_type=jnp.float32)  # (P, HW)

    # 2x2 average pool as a second matmul against a static pooling matrix.
    o_ref[...] = jnp.dot(conv, p_ref[...],
                         preferred_element_type=jnp.float32).astype(o_ref.dtype)


def sparse_transition(x_nchw, params, index, eps=1e-5):
    """Pallas implementation of SparseTransition.forward (NCHW in/out)."""
    gamma, beta, rmean, rvar, alpha, weight = (
        params["gamma"], params["beta"], params["running_mean"],
        params["running_var"], params["alpha"], params["conv_w"])

    N, C, H, W = x_nchw.shape
    P = weight.shape[0]                       # outplanes
    Ho, Wo = H // 2, W // 2

    idx = np.asarray(index, dtype=np.int64)
    F_ = idx.shape[0]
    assert alpha.reshape(-1).shape[0] == F_, (
        "Mask alpha length must equal len(index)")
    if F_ == C:
        # PyTorch ChannelSelection is a no-op when len(index) == C.
        idx = np.arange(C, dtype=np.int64)

    # Fold BN (inference) into per-channel scale / bias over ALL C channels.
    scale = (gamma / jnp.sqrt(rvar + eps)).astype(jnp.float32)
    bias = (beta - rmean * scale).astype(jnp.float32)
    s = scale.reshape(C, 1)
    b = bias.reshape(C, 1)

    # Fold channel selection + Mask alpha into the 1x1 conv weight:
    #   conv(alpha * relu_sel) == (W * alpha_row) applied on selected columns,
    #   with zero columns for non-selected channels (selection happens post-ReLU,
    #   and the conv is linear in its input channels, so this is exact).
    w2d = (weight[:, :, 0, 0] * alpha.reshape(1, -1)).astype(jnp.float32)  # (P, F)
    w_exp = jnp.zeros((P, C), jnp.float32).at[:, idx].set(w2d)             # (P, C)

    # Static 2x2 average-pooling matrix (HW, Ho*Wo); 0.25 folded in.
    pool_np = np.zeros((H * W, Ho * Wo), np.float32)
    for h in range(Ho * 2):
        for w in range(Wo * 2):
            pool_np[h * W + w, (h // 2) * Wo + (w // 2)] = 0.25
    pool = jnp.asarray(pool_np)

    # NCHW -> (N, C, H*W): free reshape, channels stay on the sublane axis.
    x_flat = x_nchw.reshape(N, C, H * W)

    out = pl.pallas_call(
        _sparse_transition_kernel,
        out_shape=jax.ShapeDtypeStruct((N, P, Ho * Wo), jnp.float32),
        grid_spec=pltpu.PrefetchScalarGridSpec(
            num_scalar_prefetch=0,
            grid=(N,),
            in_specs=[
                pl.BlockSpec((None, C, H * W), lambda n: (n, 0, 0)),
                pl.BlockSpec((C, 1), lambda n: (0, 0)),
                pl.BlockSpec((C, 1), lambda n: (0, 0)),
                pl.BlockSpec((P, C), lambda n: (0, 0)),
                pl.BlockSpec((H * W, Ho * Wo), lambda n: (0, 0)),
            ],
            out_specs=pl.BlockSpec((None, P, Ho * Wo), lambda n: (n, 0, 0)),
        ),
        compiler_params=pltpu.CompilerParams(
            dimension_semantics=("parallel",)),
    )(x_flat, s, b, w_exp, pool)

    # (N, P, Ho*Wo) -> (N, P, Ho, Wo): contiguous reshape, no transpose, no copy.
    return out.reshape(N, P, Ho, Wo)


def reference_forward(x, params, index, eps=1e-5):
    """Pure-JAX reference mirroring the PyTorch forward (eval mode)."""
    gamma, beta, rmean, rvar, alpha, weight = (
        params["gamma"], params["beta"], params["running_mean"],
        params["running_var"], params["alpha"], params["conv_w"])
    xb = (x - rmean[None, :, None, None]) / jnp.sqrt(
        rvar[None, :, None, None] + eps)
    xb = xb * gamma[None, :, None, None] + beta[None, :, None, None]
    out = jnp.maximum(xb, 0.0)
    idx = np.asarray(index)
    if idx.shape[0] != x.shape[1]:
        out = out[:, idx, :, :]
    out = out * alpha.reshape(-1)[None, :, None, None]
    out = jax.lax.conv_general_dilated(
        out, weight, window_strides=(1, 1), padding="VALID",
        dimension_numbers=("NCHW", "OIHW", "NCHW"))
    N, P, H, W = out.shape
    Ho, Wo = H // 2, W // 2
    out = out[:, :, :Ho * 2, :Wo * 2].reshape(N, P, Ho, 2, Wo, 2).mean(axis=(3, 5))
    return out


if __name__ == "__main__":
    # Small, DenseNet-transition-consistent shapes.
    N, inplanes, H, W = 2, 16, 16, 16
    outplanes = 8
    index = list(range(0, inplanes, 2))     # select 8 of 16 channels
    filters = len(index)

    key = jax.random.PRNGKey(0)
    k = jax.random.split(key, 7)

    x = jax.random.normal(k[0], (N, inplanes, H, W), dtype=jnp.float32)

    params = {
        # BatchNorm2d(inplanes) — inference-mode stats.
        "gamma": jax.random.uniform(k[1], (inplanes,), minval=0.5, maxval=1.5),
        "beta": 0.1 * jax.random.normal(k[2], (inplanes,)),
        "running_mean": 0.1 * jax.random.normal(k[3], (inplanes,)),
        "running_var": jax.random.uniform(k[4], (inplanes,), minval=0.5,
                                          maxval=1.5),
        # Mask(len(index)) — alpha ~ U[0,1) like torch.rand
        "alpha": jax.random.uniform(k[5], (1, filters)),
        # Conv2d(filters, outplanes, kernel_size=1, bias=False), OIHW
        "conv_w": 0.1 * jax.random.normal(k[6], (outplanes, filters, 1, 1),
                                          dtype=jnp.float32),
    }

    out = sparse_transition(x, params, index)
    out = jax.block_until_ready(out)

    expected = jax.block_until_ready(reference_forward(x, params, index))
    assert out.shape == (N, outplanes, H // 2, W // 2), out.shape
    np.testing.assert_allclose(np.asarray(out), np.asarray(expected),
                               rtol=1e-4, atol=1e-4)
    print("KERNEL_OK")
</pallas_src>

<mosaic_0001>
module attributes {stable_mosaic.version = 11 : i64} {
  func.func @_sparse_transition_kernel(%arg0: i32, %arg1: memref<1x16x256xf32, #tpu.memory_space<vmem>>, %arg2: memref<16x1xf32, #tpu.memory_space<vmem>>, %arg3: memref<16x1xf32, #tpu.memory_space<vmem>>, %arg4: memref<8x16xf32, #tpu.memory_space<vmem>>, %arg5: memref<256x64xf32, #tpu.memory_space<vmem>>, %arg6: memref<1x8x64xf32, #tpu.memory_space<vmem>>) attributes {dimension_semantics = [#tpu.dimension_semantics<parallel>], iteration_bounds = array<i64: 2>, scalar_prefetch = 0 : i64, scratch_operands = 0 : i64, tpu.core_type = #tpu.core_type<tc>, window_params = [{transform_indices = @transform_0, window_bounds = array<i64: 1, 16, 256>}, {pipeline_mode = #tpu.pipeline_mode<synchronous>, transform_indices = @transform_1, window_bounds = array<i64: 16, 1>}, {pipeline_mode = #tpu.pipeline_mode<synchronous>, transform_indices = @transform_2, window_bounds = array<i64: 16, 1>}, {pipeline_mode = #tpu.pipeline_mode<synchronous>, transform_indices = @transform_3, window_bounds = array<i64: 8, 16>}, {pipeline_mode = #tpu.pipeline_mode<synchronous>, transform_indices = @transform_4, window_bounds = array<i64: 256, 64>}, {transform_indices = @transform_5, window_bounds = array<i64: 1, 8, 64>}]} {
    %c0 = arith.constant 0 : index
    %c0_0 = arith.constant 0 : index
    %c0_1 = arith.constant 0 : index
    %0 = vector.load %arg1[%c0, %c0_0, %c0_1] : memref<1x16x256xf32, #tpu.memory_space<vmem>>, vector<1x16x256xf32>
    %1 = vector.shape_cast %0 : vector<1x16x256xf32> to vector<16x256xf32>
    %c0_2 = arith.constant 0 : index
    %c0_3 = arith.constant 0 : index
    %2 = vector.load %arg2[%c0_2, %c0_3] : memref<16x1xf32, #tpu.memory_space<vmem>>, vector<16x1xf32>
    %3 = vector.broadcast %2 : vector<16x1xf32> to vector<16x256xf32>
    %4 = arith.mulf %1, %3 : vector<16x256xf32>
    %c0_4 = arith.constant 0 : index
    %c0_5 = arith.constant 0 : index
    %5 = vector.load %arg3[%c0_4, %c0_5] : memref<16x1xf32, #tpu.memory_space<vmem>>, vector<16x1xf32>
    %6 = vector.broadcast %5 : vector<16x1xf32> to vector<16x256xf32>
    %7 = arith.addf %4, %6 : vector<16x256xf32>
    %cst = arith.constant 0.000000e+00 : f32
    %8 = vector.broadcast %cst : f32 to vector<16x256xf32>
    %9 = arith.maximumf %7, %8 : vector<16x256xf32>
    %c0_6 = arith.constant 0 : index
    %c0_7 = arith.constant 0 : index
    %10 = vector.load %arg4[%c0_6, %c0_7] : memref<8x16xf32, #tpu.memory_space<vmem>>, vector<8x16xf32>
    %cst_8 = arith.constant dense<0.000000e+00> : vector<8x256xf32>
    %11 = tpu.matmul %10, %9, %cst_8 {dimension_numbers = #tpu.dot_dimension_numbers<[1], [0], [0], [1], [0, 0, 1, 1], [], []>} : vector<8x16xf32>, vector<16x256xf32>, vector<8x256xf32> -> vector<8x256xf32>
    %c0_9 = arith.constant 0 : index
    %c0_10 = arith.constant 0 : index
    %12 = vector.load %arg5[%c0_9, %c0_10] : memref<256x64xf32, #tpu.memory_space<vmem>>, vector<256x64xf32>
    %cst_11 = arith.constant dense<0.000000e+00> : vector<8x64xf32>
    %13 = tpu.matmul %11, %12, %cst_11 {dimension_numbers = #tpu.dot_dimension_numbers<[1], [0], [0], [1], [0, 0, 1, 1], [], []>} : vector<8x256xf32>, vector<256x64xf32>, vector<8x64xf32> -> vector<8x64xf32>
    %c0_12 = arith.constant 0 : index
    %c0_13 = arith.constant 0 : index
    %c0_14 = arith.constant 0 : index
    %14 = vector.load %arg6[%c0_12, %c0_13, %c0_14] : memref<1x8x64xf32, #tpu.memory_space<vmem>>, vector<1x8x64xf32>
    %15 = vector.shape_cast %14 : vector<1x8x64xf32> to vector<8x64xf32>
    %16 = vector.shape_cast %13 : vector<8x64xf32> to vector<1x8x64xf32>
    tpu.vector_store %arg6[%c0_12, %c0_13, %c0_14], %16 {strides = array<i32>} : memref<1x8x64xf32, #tpu.memory_space<vmem>>, vector<1x8x64xf32>,
    return
  }
  func.func @transform_0(%arg0: i32) -> (i32, i32, i32) {
    %c0_i32 = arith.constant 0 : i32
    %c0_i32_0 = arith.constant 0 : i32
    %c0_i32_1 = arith.constant 0 : i32
    return %arg0, %c0_i32, %c0_i32_0 : i32, i32, i32
  }
  func.func @transform_1(%arg0: i32) -> (i32, i32) {
    %c0_i32 = arith.constant 0 : i32
    %c0_i32_0 = arith.constant 0 : i32
    %c0_i32_1 = arith.constant 0 : i32
    return %c0_i32, %c0_i32_0 : i32, i32
  }
  func.func @transform_2(%arg0: i32) -> (i32, i32) {
    %c0_i32 = arith.constant 0 : i32
    %c0_i32_0 = arith.constant 0 : i32
    %c0_i32_1 = arith.constant 0 : i32
    return %c0_i32, %c0_i32_0 : i32, i32
  }
  func.func @transform_3(%arg0: i32) -> (i32, i32) {
    %c0_i32 = arith.constant 0 : i32
    %c0_i32_0 = arith.constant 0 : i32
    %c0_i32_1 = arith.constant 0 : i32
    return %c0_i32, %c0_i32_0 : i32, i32
  }
  func.func @transform_4(%arg0: i32) -> (i32, i32) {
    %c0_i32 = arith.constant 0 : i32
    %c0_i32_0 = arith.constant 0 : i32
    %c0_i32_1 = arith.constant 0 : i32
    return %c0_i32, %c0_i32_0 : i32, i32
  }
  func.func @transform_5(%arg0: i32) -> (i32, i32, i32) {
    %c0_i32 = arith.constant 0 : i32
    %c0_i32_0 = arith.constant 0 : i32
    %c0_i32_1 = arith.constant 0 : i32
    return %arg0, %c0_i32, %c0_i32_0 : i32, i32, i32
  }
}

</mosaic_0001>

<bundles_post_ra>
// kernel: tpu_custom_call.1
= control target key start
LH: loop header
LB: loop body
LE: loop exit
PB: predicated region body
PF: predicated region fallthrough
CT: control target
= control target key end

     0   :  { %10 = vsyncpa [#allocation3], 0  ;;  %s951_s0 = inlined_call_operand.vmem [shape: f32[2,16,256], index: 0, kind: input, shape index: {}]   ;;  %s952_s1 = inlined_call_operand.vmem [shape: f32[16,1], index: 1, kind: input, shape index: {}]   ;;  %s953_s2 = inlined_call_operand.vmem [shape: f32[16,1], index: 2, kind: input, shape index: {}]   ;;  %s954_s3 = inlined_call_operand.vmem [shape: f32[8,16], index: 3, kind: input, shape index: {}]   ;;  %s955_s4 = inlined_call_operand.vmem [shape: f32[256,64], index: 4, kind: input, shape index: {}]   ;;  %s956_s5 = inlined_call_operand.hbm [shape: f32[2,8,64], index: 5, kind: output, shape index: {}]  }
   0x1   :  { %12 = vsyncpa [#allocation3 + $0x1], 0  ;;  %s740_s18 = smov 0   ;;  %s742_s19 = smov 0  }
   0x2   :  { %s744_s20 = smov 0   ;;  %s746_s21 = smov 0  }
   0x3 LB: > { %s761_s22 = sadd.s32 4294967295, %s705_s21   ;;  %s516_s23 = sadd.s32 4294967294, %s705_s21   ;;  %s705_s21 = sphi %s746_s21, %s962_s21   ;;  %s701_s20 = sphi %s744_s20, %s961_s20   ;;  %s697_s19 = sphi %s742_s19, %s960_s19   ;;  %s693_s18 = sphi %s740_s18, %s959_s18  }
   0x4   : > { %s765_s24 = sadd.s32 1, %s705_s21   ;;  %s135_s25 = sadd.s32 1, %s701_s20 }
   0x5   : > { %s132_s26 = ssub.s32 %s705_s21, %s765_s24  ;;  %p145_p0 = scmp.ne.s32.totalorder %s701_s20, %s697_s19 }
   0x6   : > { %p133_p1 = scmp.eq.s32.totalorder %s132_s26, 0  ;;  %p146_p2 = scmp.eq.s32.totalorder %s761_s22, 1 }
   0x7   : > { %p151_p3 = scmp.ne.s32.totalorder %s697_s19, %s693_s18  ;;  %p152_p4 = scmp.eq.s32.totalorder %s516_s23, 1 }
   0x8   : > { %s776_s27 = scalar_select %p133_p1, %s701_s20, %s135_s25  }
   0x9   : > { %p778_p5 = por %p146_p2, %p145_p0  ;;  %p782_p6 = por %p152_p4, %p151_p3 }
   0xa   : > { %p519_p7 = scmp.ge.s32.totalorder %s705_s21, 1  ;;  %p190_p8 = scmp.lt.s32.totalorder %s705_s21, 3 }
   0xc   : > { %p191_p9 = pnand %p519_p7, %p190_p8 }
   0xd   : > { %v243_v0 = vld [vmem:[%s953_s2] sm:$0xff] (!%p191_p9)  ;;  %v707_v2 = vmov (!%p191_p9), 0   ;;  %v244_v3 = vld [vmem:[%s953_s2 + $0x8] sm:$0xff] (!%p191_p9)  ;;  %v708_v5 = vmov (!%p191_p9), 0.0   ;;  %v357_v11 = vld [vmem:[%s955_s4 + $0x90] sm:$0xff] (!%p191_p9)  ;;  %p218_p10 = scmp.lt.s32.totalorder (!%p191_p9), %s761_s22, 1 }
   0xe   : > { %194 = sbr.rel (%p191_p9) target bundleno = 602 (0x25a), region = 40  ;;  %v227_v1 = vld [vmem:[%s952_s1] sm:$0xff] (!%p191_p9)  ;;  %642 = vset.pattern.permute.xlu1 (!%p191_p9), %v707_v2  ;;  %641 = vset.pattern.permute.xlu0 (!%p191_p9), %v707_v2  ;;  %v228_v4 = vld [vmem:[%s952_s1 + $0x8] sm:$0xff] (!%p191_p9)  ;;  %v358_v12 = vld [vmem:[%s955_s4 + $0x98] sm:$0xff] (!%p191_p9)  ;;  %vm264_vm0 = vcmask (!%p191_p9), 130048   ;;  %s215_s26 = sand.u32 (!%p191_p9), 1, %s697_s19  }
   0xf   : > { %247 = vperm.xlu1 (!%p191_p9), %642, %v243_v0   ;;  %231 = vperm.xlu0 (!%p191_p9), %641, %v227_v1   ;;  %v355_v6 = vld [vmem:[%s955_s4 + $0x80] sm:$0xff] (!%p191_p9)  ;;  %v356_v7 = vld [vmem:[%s955_s4 + $0x88] sm:$0xff] (!%p191_p9)  ;;  %v572_v14 = vpack.c.bf16 (!%p191_p9), %v358_v12, %v357_v11  ;;  %v341_v15 = vld [vmem:[%s955_s4 + $0x10] sm:$0xff] (!%p191_p9)  ;;  %s520_s30 = sshll.u32 (!%p191_p9), %s215_s26, 3  ;;  %s525_s6 = sshll.u32 (!%p191_p9), %s761_s22, 7  ;;  %vm441_vm1 = vcmask (!%p191_p9), 523264  }
  0x10   : > { %332 = vmatprep.mubr.f32.mxu0 (!%p191_p9), %v708_v5  ;;  %v339_v8 = vld [vmem:[%s955_s4] sm:$0xff] (!%p191_p9)  ;;  %v568_v9 = vpack.c.bf16 (!%p191_p9), %v356_v7, %v355_v6  ;;  %v340_v10 = vld [vmem:[%s955_s4 + $0x8] sm:$0xff] (!%p191_p9)  ;;  %v342_v16 = vld [vmem:[%s955_s4 + $0x18] sm:$0xff] (!%p191_p9)  ;;  %s217_s7 = scalar_lea.vmem (!%p191_p9), [#allocation2], %s520_s30  ;;  %s909_s11 = scalar_lea.hbm (!%p191_p9), %s956_s5, %s525_s6 }
  0x11   : > { %v570_v13 = vpack.c.bf16 (!%p191_p9), %v340_v10, %v339_v8  ;;  %v359_v17 = vld [vmem:[%s955_s4 + $0xa0] sm:$0xff] (!%p191_p9)  ;;  %v360_v18 = vld [vmem:[%s955_s4 + $0xa8] sm:$0xff] (!%p191_p9)  ;;  %v574_v19 = vpack.c.bf16 (!%p191_p9), %v342_v16, %v341_v15  ;;  %v361_v23 = vld [vmem:[%s955_s4 + $0xb0] sm:$0xff] (!%p191_p9)  ;;  %s457_s8 = sshll.u32 (!%p191_p9), %s217_s7, 4  ;;  %s444_s12 = scalar_lea.sflag (!%p191_p9), [#allocation3], %s215_s26  ;;  %s911_s8 = int_to_ptr.vmem [resolvable:$true] %s457_s8 }
  0x12   : > { %569 = vmatprep.subr.bf16.mxu1 (!%p191_p9), %v568_v9  ;;  %v576_v20 = vpack.c.bf16 (!%p191_p9), %v360_v18, %v359_v17  ;;  %v343_v21 = vld [vmem:[%s955_s4 + $0x20] sm:$0xff] (!%p191_p9)  ;;  %v344_v22 = vld [vmem:[%s955_s4 + $0x28] sm:$0xff] (!%p191_p9)  ;;  %v362_v24 = vld [vmem:[%s955_s4 + $0xb8] sm:$0xff] (!%p191_p9) }
  0x13   : > { %252 = vperm.xlu1 (!%p191_p9), %642, %v244_v3   ;;  %236 = vperm.xlu0 (!%p191_p9), %641, %v228_v4   ;;  %v578_v25 = vpack.c.bf16 (!%p191_p9), %v344_v22, %v343_v21  ;;  %v580_v26 = vpack.c.bf16 (!%p191_p9), %v362_v24, %v361_v23  ;;  %v345_v27 = vld [vmem:[%s955_s4 + $0x30] sm:$0xff] (!%p191_p9)  ;;  %v346_v28 = vld [vmem:[%s955_s4 + $0x38] sm:$0xff] (!%p191_p9)  ;;  %v363_v29 = vld [vmem:[%s955_s4 + $0xc0] sm:$0xff] (!%p191_p9) }
  0x14   : > { %571 = vmatpush3.bf16.msra.mxu1 (!%p191_p9), %v570_v13  ;;  %v364_v30 = vld [vmem:[%s955_s4 + $0xc8] sm:$0xff] (!%p191_p9)  ;;  %v582_v31 = vpack.c.bf16 (!%p191_p9), %v346_v28, %v345_v27  ;;  %v347_v33 = vld [vmem:[%s955_s4 + $0x40] sm:$0xff] (!%p191_p9)  ;;  %v365_v35 = vld [vmem:[%s955_s4 + $0xd0] sm:$0xff] (!%p191_p9) }
  0x15   : > { %573 = vmatprep.subr.bf16.mxu1 %v572_v14  ;;  %v584_v32 = vpack.c.bf16 %v364_v30, %v363_v29  ;;  %v348_v34 = vld [vmem:[%s955_s4 + $0x48] sm:$0xff]  ;;  %v366_v36 = vld [vmem:[%s955_s4 + $0xd8] sm:$0xff]  ;;  %v349_v39 = vld [vmem:[%s955_s4 + $0x50] sm:$0xff]  ;;  %s219_s9 = scalar_select %p218_p10, %s761_s22, 1 }
  0x16   : > { %v586_v37 = vpack.c.bf16 %v348_v34, %v347_v33  ;;  %v588_v38 = vpack.c.bf16 %v366_v36, %v365_v35  ;;  %v350_v40 = vld [vmem:[%s955_s4 + $0x58] sm:$0xff]  ;;  %v367_v41 = vld [vmem:[%s955_s4 + $0xe0] sm:$0xff]  ;;  %v368_v42 = vld [vmem:[%s955_s4 + $0xe8] sm:$0xff]  ;;  %s709_s22 = smov [#allocation2]  }
  0x17   : > { %v590_v43 = vpack.c.bf16 %v350_v40, %v349_v39  ;;  %v592_v44 = vpack.c.bf16 %v368_v42, %v367_v41  ;;  %v351_v45 = vld [vmem:[%s955_s4 + $0x60] sm:$0xff]  ;;  %v352_v46 = vld [vmem:[%s955_s4 + $0x68] sm:$0xff]  ;;  %v369_v47 = vld [vmem:[%s955_s4 + $0xf0] sm:$0xff]  ;;  %s528_s10 = sshll.u32 %s219_s9, 5  ;;  %s647_s14 = sshll.u32 %s709_s22, 4  ;;  %s648_s14 = int_to_ptr.vmem [resolvable:$false] %s647_s14 }
  0x18   : > { %575 = vmatpush3.bf16.msra.mxu1 %v574_v19  ;;  %v370_v48 = vld [vmem:[%s955_s4 + $0xf8] sm:$0xff]  ;;  %v594_v49 = vpack.c.bf16 %v352_v46, %v351_v45  ;;  %s222_s13 = scalar_lea.vmem %s951_s0, %s528_s10  ;;  %v263_v9 = vld [vmem:[%s954_s3] sm:$0xff]  ;;  %v353_v10 = vld [vmem:[%s955_s4 + $0x70] sm:$0xff]  ;;  %s649_s15 = scalar_lea.vmem %s648_s14, 256 }
  0x19   : > { %577 = vmatprep.subr.bf16.mxu1 %v576_v20  ;;  %v596_v50 = vpack.c.bf16 %v370_v48, %v369_v47  ;;  %v223_v51 = vld [vmem:[%s222_s13] sm:$0xff]  ;;  %v224_v52 = vld [vmem:[%s222_s13 + $0x8] sm:$0xff]  ;;  %v225_v57 = vld [vmem:[%s222_s13 + $0x10] sm:$0xff]  ;;  %p650_p0 = scmp.lt.s32.totalorder %s911_s8, %s648_s14 }
  0x1a   : > { %v226_v58 = vld [vmem:[%s222_s13 + $0x18] sm:$0xff]  ;;  %s643_s13 = scalar_lea.vmem %s911_s8, 128 }
  0x1b   : > { %v354_v11 = vld [vmem:[%s955_s4 + $0x78] sm:$0xff]  ;;  %p644_p11 = scmp.ne.s32.totalorder %s911_s8, %s643_s13  ;;  %p651_p1 = scmp.lt.s32.totalorder %s649_s15, %s643_s13 }
  0x1c   : > { %579 = vmatpush3.bf16.msra.mxu1 %v578_v25  ;;  %v598_v12 = vpack.c.bf16 %v354_v11, %v353_v10 }
  0x1d   : > { %581 = vmatprep.subr.bf16.mxu1 %v580_v26  ;;  %p645_p12 = pnand %p644_p11, %p778_p5  ;;  %p652_p2 = por %p651_p1, %p650_p0 }
  0x1f   : > { %p646_p13 = pneg %p645_p12 }
  0x20   : > { %583 = vmatpush3.bf16.msra.mxu1 %v582_v31 }
  0x21   : > { %585 = vmatprep.subr.bf16.mxu1 %v584_v32  ;;  %p653_p3 = pnand %p652_p2, %p646_p13 }
  0x24   : > { %587 = vmatpush3.bf16.msra.mxu1 %v586_v37 }
  0x25   : > { %589 = vmatprep.subr.bf16.mxu1 %v588_v38 }
  0x28   : > { %591 = vmatpush3.bf16.msra.mxu1 %v590_v43 }
  0x29   : > { %593 = vmatprep.subr.bf16.mxu1 %v592_v44 }
  0x2c   : > { %595 = vmatpush3.bf16.msra.mxu1 %v594_v49 }
  0x2d   : > { %597 = vmatprep.subr.bf16.mxu1 %v596_v50 }
  0x30   : > { %599 = vmatpush3.bf16.msra.mxu1 %v598_v12 }
  0x8e   : > { %v248_v53 = vpop.permute.xlu1 %247  ;;  %v232_v54 = vpop.permute.xlu0 %231 }
  0x8f   : > { %v239_v55 = vmul.f32 %v232_v54, %v223_v51  ;;  %v240_v56 = vmul.f32 %v232_v54, %v224_v52 }
  0x91   : > { %v255_v60 = vadd.f32 %v248_v53, %v239_v55  ;;  %v256_v63 = vadd.f32 %v248_v53, %v240_v56 }
  0x92   : > { %v237_v59 = vpop.permute.xlu0 %236  ;;  %v253_v0 = vpop.permute.xlu1 %252 }
  0x93   : > { %v241_v61 = vmul.f32 %v237_v59, %v225_v57  ;;  %v242_v62 = vmul.f32 %v237_v59, %v226_v58  ;;  %v260_v4 = vmax.f32 %v256_v63, 0.0  ;;  %v259_v6 = vmax.f32 %v255_v60, 0.0 }
  0x95   : > { %v257_v1 = vadd.f32 %v253_v0, %v241_v61  ;;  %v258_v2 = vadd.f32 %v253_v0, %v242_v62 }
  0x97   : > { %v261_v3 = vmax.f32 %v257_v1, 0.0  ;;  %v262_v5 = vmax.f32 %v258_v2, 0.0 }
  0x99   : > { %v564_v7 = vpack.c.bf16 %v262_v5, %v260_v4  ;;  %v566_v8 = vpack.c.bf16 %v261_v3, %v259_v6 }
  0x9b   : > { %565 = vmatprep.subr.bf16.mxu0 %v564_v7 }
  0x9c   : > { %567 = vmatpush1.bf16.msra.mxu0 %v566_v8 }
  0x9f   : > { %523 = vmatmul.mubr.msk.f32.vlgmr.msra.gmra.mrb[0].mxu0 %vm264_vm0, %v263_v9 }
 0x172   : > { %v334_v13 = vpop.f32.mrb[0].mxu0 }
 0x173   : > { %v336_v14 = vpop.f32.mrb[1].mxu0 }
 0x174   : > { %435 = vmatprep.mubr.f32.mxu1 %v336_v14 }
 0x175   : > { %436 = vmatmul.mubr.f32.vlgmr.msra.gmra.mrb[0].mxu1 %v334_v13 }
 0x248   : > { %v561_v15 = vpop.f32.mrb[0].mxu1 }
 0x249   : > { %v562_v16 = vpop.f32.mrb[1].mxu1 }
 0x24a   : > { %v563_v17 = vadd.f32 %v562_v16, %v561_v15 }
 0x24c   : > { %442 = vst.msk [vmem:[%s217_s7] sm:$0xff] %vm441_vm1, %v563_v17 }
 0x24d   : > { %656 = shalt.err (!%p653_p3)
}
 0x24e   : > { %s657_s16 = scalar_lea.hbm %s909_s11, 128  ;;  %s661_s25 = scalar_lea.hbm %s956_s5, 256 }
 0x24f   : > { %p658_p4 = scmp.ne.s32.totalorder %s909_s11, %s657_s16  ;;  %p662_p9 = scmp.lt.u32.totalorder %s909_s11, %s956_s5 }
 0x250   : > { %p663_p10 = scmp.lt.u32.totalorder %s661_s25, %s657_s16  ;;  %p665_p12 = scmp.lt.u32.totalorder %s657_s16, %s909_s11 }
 0x251   : > { %p659_p7 = pnand %p658_p4, %p778_p5 }
 0x252   : > { %p664_p11 = por %p663_p10, %p662_p9 }
 0x253   : > { %p660_p8 = pneg %p659_p7 }
 0x254   : > { %p666_p13 = por %p665_p12, %p664_p11 }
 0x256   : > { %p667_p0 = pnand %p666_p13, %p660_p8 }
 0x258   : > { %670 = shalt.err (!%p667_p0)
}
 0x259   : > { %600 = dma.vmem_to_hbm [thread:$0]  (%p778_p5), %s911_s8, 128, %s909_s11, %s444_s12  }
 0x25a PF: > { %p606_p1 = scmp.ge.s32.totalorder %s705_s21, 2  ;;  %s469_s6 = sand.u32 1, %s693_s18  }
 0x25b   : > { %s470_s7 = scalar_lea.sflag [#allocation3], %s469_s6 }
 0x25c   : > { %p603_p2 = pnand %p606_p1, %p782_p6 }
 0x25e   : > { %688 = dma.done.wait (!%p603_p2), %s470_s7, 128  }
 0x25f   : > { %690 = vsyncadd (!%p603_p2), %s470_s7, 4294967168  ;;  %p15_p3 = scmp.ge.s32.totalorder %s765_s24, 4   ;;  %s959_s18 = smov %s697_s19 }
 0x260   : > { %s960_s19 = smov %s701_s20  ;;  %s961_s20 = smov %s776_s27 }
 0x261   : > { %s962_s21 = smov %s765_s24  ;;  %17 = sbr.rel (!%p15_p3) target bundleno = 3 (0x3), region = 75 }
 0x268   :  { %475 = vsyncpa [#allocation3], 1 }
 0x269   :  { %477 = vsyncpa [#allocation3 + $0x1], 1 }

</bundles_post_ra>
